<compile_context>
chip_gen: v7x
topology: tpu7x:2x2x1
jax: 0.10.0
libtpu: 0.0.40
codegen_flags: <defaults>
</compile_context>

<pallas_src>
import math
import numpy as np

import jax
import jax.numpy as jnp
from jax.experimental import pallas as pl
from jax.experimental.pallas import tpu as pltpu

LANE = 128      # vreg lane width
SUBLANE = 8     # vreg sublane depth (f32)


def _leaky_relu(x, slope=0.1):
    return jnp.where(x > 0, x, slope * x)


def make_hypernet_kernel(n_layers, w_offsets, noise_shape):
    """Build the fused-MLP kernel for a fixed packed-slab layout.

    Slab layout (all f32, width LANE):
      rows [0, SUBLANE)                : bias of layer i in row i (zero padded)
      rows [w_offsets[0], +SUBLANE)    : layer-0 weight, row k = w0[k, :] padded
      rows [w_offsets[i], +LANE) i>=1  : layer-i weight, zero padded to 128x128
    """

    def kernel(x_ref, p_ref, o_ref):
        biases = p_ref[0:SUBLANE, :]          # single (8,128) vreg load
        x = x_ref[...]                        # (N, noise_shape)

        # ---- Layer 0: K = noise_shape (tiny) -> VPU broadcast, no MXU ----
        w0_off = w_offsets[0]
        h = biases[0:1, :] + x[:, 0:1] * p_ref[w0_off:w0_off + 1, :]
        for k in range(1, noise_shape):       # unrolled, noise_shape is small
            h = h + x[:, k:k + 1] * p_ref[w0_off + k:w0_off + k + 1, :]
        h = _leaky_relu(h)                    # (N, 128); padded lanes stay 0

        # ---- Layers 1..n-1: aligned (N,128)@(128,128) MXU matmuls ----
        for i in range(1, n_layers):
            w = p_ref[w_offsets[i]:w_offsets[i] + LANE, :]
            h = jnp.dot(h, w, preferred_element_type=jnp.float32)
            h = h + biases[i:i + 1, :]
            if i < n_layers - 1:
                h = _leaky_relu(h)

        o_ref[...] = h.astype(o_ref.dtype)    # lane-dense (N, 128) store

    return kernel


def init_hypernet_params(key, shape, units=(16, 32, 64), noise_shape=1,
                         dtype=jnp.float32):
    """PyTorch nn.Linear-style init (uniform(+/- 1/sqrt(fan_in)) for W and b).

    Returns a list of (w, b) at TRUE sizes with w stored as (in, out)."""
    dims = [noise_shape, *units, int(np.prod(shape))]
    params = []
    for i in range(len(dims) - 1):
        fan_in, fan_out = dims[i], dims[i + 1]
        key, kw, kb = jax.random.split(key, 3)
        bound = 1.0 / math.sqrt(fan_in)
        w = jax.random.uniform(kw, (fan_in, fan_out), dtype, -bound, bound)
        b = jax.random.uniform(kb, (fan_out,), dtype, -bound, bound)
        params.append((w, b))
    return params


def pack_hypernet_params(params, dtype=jnp.float32):
    """One-time packing of all weights/biases into a single lane-aligned slab.

    Returns (slab (total_rows, 128), w_offsets, noise_shape)."""
    n_layers = len(params)
    noise_shape = params[0][0].shape[0]
    assert n_layers <= SUBLANE, "bias block holds at most 8 layers"
    assert noise_shape <= SUBLANE, \
        "layer-0 VPU path assumes noise_shape <= 8"
    for i, (w, _) in enumerate(params):
        assert w.shape[1] <= LANE, (
            "per-layer out_features must be <= 128; larger prod(shape) needs "
            "an output-column grid (see TODO at top of file)")
        if i >= 1:
            assert w.shape[0] <= LANE

    weight_rows = [SUBLANE] + [LANE] * (n_layers - 1)
    total_rows = SUBLANE + sum(weight_rows)          # bias block + weights
    slab = np.zeros((total_rows, LANE), dtype=np.float32)

    # Biases: row i = bias of layer i, zero padded to 128 lanes.
    for i, (_, b) in enumerate(params):
        b_np = np.asarray(b)
        slab[i, :b_np.shape[0]] = b_np

    # Weights: zero padded blocks, sublane-aligned offsets.
    w_offsets = []
    off = SUBLANE
    for i, (w, _) in enumerate(params):
        w_np = np.asarray(w)
        slab[off:off + w_np.shape[0], :w_np.shape[1]] = w_np
        w_offsets.append(off)
        off += weight_rows[i]

    return jnp.asarray(slab, dtype), tuple(w_offsets), noise_shape


def hypernet_weight_forward(x, packed, shape):
    """x: (N, noise_shape) -> (N, *shape) using the fused Pallas kernel."""
    slab, w_offsets, noise_shape = packed
    n = x.shape[0]
    out_dim = int(np.prod(shape))
    n_layers = len(w_offsets)

    kernel = make_hypernet_kernel(n_layers, w_offsets, noise_shape)

    # No grid: everything is a full VMEM block (2 input DMAs total), and the
    # output is a lane-dense (N, 128) slab.
    flat_padded = pl.pallas_call(
        kernel,
        out_shape=jax.ShapeDtypeStruct((n, LANE), x.dtype),
        in_specs=[pl.BlockSpec(memory_space=pltpu.MemorySpace.VMEM),
                  pl.BlockSpec(memory_space=pltpu.MemorySpace.VMEM)],
        out_specs=pl.BlockSpec(memory_space=pltpu.MemorySpace.VMEM),
    )(x, slab)

    return flat_padded[:, :out_dim].reshape((n,) + tuple(shape))


if __name__ == "__main__":
    # Module config: HypernetWeight(shape=(4, 3, 3), units=[16, 32, 64],
    #                               noise_shape=1); forward(None, num_samples=2)
    shape = (4, 3, 3)
    noise_shape = 1
    num_samples = 2

    key = jax.random.PRNGKey(0)
    key_params, key_x = jax.random.split(key)

    params = init_hypernet_params(key_params, shape, units=(16, 32, 64),
                                  noise_shape=noise_shape)
    packed = pack_hypernet_params(params)

    # x is None in the PyTorch module -> sample standard normal noise.
    x = jax.random.normal(key_x, (num_samples, noise_shape), jnp.float32)

    out = hypernet_weight_forward(x, packed, shape)
    out = jax.block_until_ready(out)

    # Cross-check against a pure-JAX reference of the same (unpadded) MLP.
    def ref_forward(x, params, shape):
        h = x
        for i, (w, b) in enumerate(params):
            h = h @ w + b[None, :]
            if i < len(params) - 1:
                h = jnp.where(h > 0, h, 0.1 * h)
        return h.reshape((x.shape[0],) + tuple(shape))

    ref = jax.block_until_ready(ref_forward(x, params, shape))
    assert out.shape == (num_samples,) + shape
    np.testing.assert_allclose(np.asarray(out), np.asarray(ref),
                               rtol=1e-5, atol=1e-5)

    print("KERNEL_OK")
</pallas_src>

<mosaic_0001>
module attributes {stable_mosaic.version = 11 : i64} {
  func.func @kernel(%arg0: memref<2x1xf32, #tpu.memory_space<vmem>>, %arg1: memref<400x128xf32, #tpu.memory_space<vmem>>, %arg2: memref<2x128xf32, #tpu.memory_space<vmem>>) attributes {dimension_semantics = [], scalar_prefetch = 0 : i64, scratch_operands = 0 : i64, tpu.core_type = #tpu.core_type<tc>} {
    %c0 = arith.constant 0 : index
    %c0_0 = arith.constant 0 : index
    %0 = vector.load %arg1[%c0, %c0_0] : memref<400x128xf32, #tpu.memory_space<vmem>>, vector<8x128xf32>
    %c0_1 = arith.constant 0 : index
    %c0_2 = arith.constant 0 : index
    %1 = vector.load %arg0[%c0_1, %c0_2] : memref<2x1xf32, #tpu.memory_space<vmem>>, vector<2x1xf32>
    %2 = vector.extract_strided_slice %0 {offsets = [0, 0], sizes = [1, 128], strides = [1, 1]} : vector<8x128xf32> to vector<1x128xf32>
    %c8 = arith.constant 8 : index
    %c0_3 = arith.constant 0 : index
    %3 = vector.load %arg1[%c8, %c0_3] : memref<400x128xf32, #tpu.memory_space<vmem>>, vector<1x128xf32>
    %4 = vector.broadcast %1 : vector<2x1xf32> to vector<2x128xf32>
    %5 = vector.broadcast %3 : vector<1x128xf32> to vector<2x128xf32>
    %6 = arith.mulf %4, %5 : vector<2x128xf32>
    %7 = vector.broadcast %2 : vector<1x128xf32> to vector<2x128xf32>
    %8 = arith.addf %7, %6 : vector<2x128xf32>
    %cst = arith.constant 0.000000e+00 : f32
    %9 = vector.broadcast %cst : f32 to vector<2x128xf32>
    %10 = arith.cmpf ogt, %8, %9 : vector<2x128xf32>
    %cst_4 = arith.constant 1.000000e-01 : f32
    %11 = vector.broadcast %cst_4 : f32 to vector<2x128xf32>
    %12 = arith.mulf %11, %8 : vector<2x128xf32>
    %13 = arith.select %10, %8, %12 : vector<2x128xi1>, vector<2x128xf32>
    %c16 = arith.constant 16 : index
    %c0_5 = arith.constant 0 : index
    %14 = vector.load %arg1[%c16, %c0_5] : memref<400x128xf32, #tpu.memory_space<vmem>>, vector<128x128xf32>
    %cst_6 = arith.constant dense<0.000000e+00> : vector<2x128xf32>
    %15 = tpu.matmul %13, %14, %cst_6 {dimension_numbers = #tpu.dot_dimension_numbers<[1], [0], [0], [1], [0, 0, 1, 1], [], []>} : vector<2x128xf32>, vector<128x128xf32>, vector<2x128xf32> -> vector<2x128xf32>
    %16 = vector.extract_strided_slice %0 {offsets = [1, 0], sizes = [1, 128], strides = [1, 1]} : vector<8x128xf32> to vector<1x128xf32>
    %17 = vector.broadcast %16 : vector<1x128xf32> to vector<2x128xf32>
    %18 = arith.addf %15, %17 : vector<2x128xf32>
    %cst_7 = arith.constant 0.000000e+00 : f32
    %19 = vector.broadcast %cst_7 : f32 to vector<2x128xf32>
    %20 = arith.cmpf ogt, %18, %19 : vector<2x128xf32>
    %cst_8 = arith.constant 1.000000e-01 : f32
    %21 = vector.broadcast %cst_8 : f32 to vector<2x128xf32>
    %22 = arith.mulf %21, %18 : vector<2x128xf32>
    %23 = arith.select %20, %18, %22 : vector<2x128xi1>, vector<2x128xf32>
    %c144 = arith.constant 144 : index
    %c0_9 = arith.constant 0 : index
    %24 = vector.load %arg1[%c144, %c0_9] : memref<400x128xf32, #tpu.memory_space<vmem>>, vector<128x128xf32>
    %cst_10 = arith.constant dense<0.000000e+00> : vector<2x128xf32>
    %25 = tpu.matmul %23, %24, %cst_10 {dimension_numbers = #tpu.dot_dimension_numbers<[1], [0], [0], [1], [0, 0, 1, 1], [], []>} : vector<2x128xf32>, vector<128x128xf32>, vector<2x128xf32> -> vector<2x128xf32>
    %26 = vector.extract_strided_slice %0 {offsets = [2, 0], sizes = [1, 128], strides = [1, 1]} : vector<8x128xf32> to vector<1x128xf32>
    %27 = vector.broadcast %26 : vector<1x128xf32> to vector<2x128xf32>
    %28 = arith.addf %25, %27 : vector<2x128xf32>
    %cst_11 = arith.constant 0.000000e+00 : f32
    %29 = vector.broadcast %cst_11 : f32 to vector<2x128xf32>
    %30 = arith.cmpf ogt, %28, %29 : vector<2x128xf32>
    %cst_12 = arith.constant 1.000000e-01 : f32
    %31 = vector.broadcast %cst_12 : f32 to vector<2x128xf32>
    %32 = arith.mulf %31, %28 : vector<2x128xf32>
    %33 = arith.select %30, %28, %32 : vector<2x128xi1>, vector<2x128xf32>
    %c272 = arith.constant 272 : index
    %c0_13 = arith.constant 0 : index
    %34 = vector.load %arg1[%c272, %c0_13] : memref<400x128xf32, #tpu.memory_space<vmem>>, vector<128x128xf32>
    %cst_14 = arith.constant dense<0.000000e+00> : vector<2x128xf32>
    %35 = tpu.matmul %33, %34, %cst_14 {dimension_numbers = #tpu.dot_dimension_numbers<[1], [0], [0], [1], [0, 0, 1, 1], [], []>} : vector<2x128xf32>, vector<128x128xf32>, vector<2x128xf32> -> vector<2x128xf32>
    %36 = vector.extract_strided_slice %0 {offsets = [3, 0], sizes = [1, 128], strides = [1, 1]} : vector<8x128xf32> to vector<1x128xf32>
    %37 = vector.broadcast %36 : vector<1x128xf32> to vector<2x128xf32>
    %38 = arith.addf %35, %37 : vector<2x128xf32>
    %c0_15 = arith.constant 0 : index
    %c0_16 = arith.constant 0 : index
    %39 = vector.load %arg2[%c0_15, %c0_16] : memref<2x128xf32, #tpu.memory_space<vmem>>, vector<2x128xf32>
    tpu.vector_store %arg2[%c0_15, %c0_16], %38 {strides = array<i32>} : memref<2x128xf32, #tpu.memory_space<vmem>>, vector<2x128xf32>,
    return
  }
}

</mosaic_0001>

<bundles_post_ra>
// kernel: tpu_custom_call.1
= control target key start
LH: loop header
LB: loop body
LE: loop exit
PB: predicated region body
PF: predicated region fallthrough
CT: control target
= control target key end

     0   :  { %7 = vsyncpa [#allocation3], 0  ;;  %s717_s0 = inlined_call_operand.vmem [shape: f32[2,1], index: 0, kind: input, shape index: {}]   ;;  %s718_s1 = inlined_call_operand.hbm [shape: f32[400,128], index: 1, kind: input, shape index: {}]   ;;  %s719_s2 = inlined_call_operand.hbm [shape: f32[2,128], index: 2, kind: output, shape index: {}]  }
   0x1   :  { %8 = vsyncpa [#allocation4], 0  ;;  %s625_s9 = smov [#allocation2]   ;;  %s577_s13 = scalar_lea.hbm %s718_s1, 6400 }
   0x2   :  { %s16_s10 = sshll.u32 %s625_s9, 4  ;;  %p578_p0 = scmp.ne.s32.totalorder %s718_s1, %s577_s13  ;;  %s17_s10 = int_to_ptr.vmem [resolvable:$true] %s16_s10 }
   0x3   :  { %p581_p1 = scmp.lt.u32.totalorder %s577_s13, %s718_s1 }
   0x5   :  { %p583_p2 = pnand %p581_p1, %p578_p0 }
   0x7   :  { %586 = shalt.err (!%p583_p2)
}
   0x8   :  { %s587_s18 = scalar_lea.vmem %s17_s10, 6400  ;;  %p592_p4 = scmp.lt.s32.totalorder %s17_s10, %s17_s10 }
   0x9   :  { %p588_p3 = scmp.ne.s32.totalorder %s17_s10, %s587_s18  ;;  %p593_p5 = scmp.lt.s32.totalorder %s587_s18, %s587_s18 }
   0xb   :  { %p594_p6 = por %p593_p5, %p592_p4 }
   0xd   :  { %p595_p7 = pnand %p594_p6, %p588_p3 }
   0xf   :  { %598 = shalt.err (!%p595_p7)
}
  0x10   :  { %s626_s19 = smov 128   ;;  %s627_s20 = smov 8  }
  0x11   :  { %22 = dma.hbm_to_vmem [thread:$0]  %s718_s1, 6400, %s17_s10, [#allocation3], %s626_s19, %s626_s19, %s627_s20  }
  0x12   :  { %621 = dma.done.wait [#allocation3], 6400  }
  0x13   :  { %622 = vsyncadd [#allocation3], 4294960896  ;;  %v628_v0 = vmov 0   ;;  %v629_v1 = vmov 0.0|0.0   ;;  %v27_v2 = vld [vmem:[%s717_s0] sm:$0x3]  ;;  %v39_v49 = vlaneseq }
  0x14   :  { %576 = vset.pattern.permute.xlu0 %v628_v0  ;;  %496 = vmatprep.subr.bf16.mxu0 %v629_v1  ;;  %v47_v3 = vld [vmem:[#allocation2 + $0x10] sm:$0xff]  ;;  %v48_v4 = vld [vmem:[#allocation2 + $0x18] sm:$0xff]  ;;  %v49_v6 = vld [vmem:[#allocation2 + $0x20] sm:$0xff]  ;;  %vm630_vm0 = vmmov 0   ;;  %v631_v11 = vmov 0.0   ;;  %s632_s0 = smov [#allocation5]  }
  0x15   :  { %520 = vmatprep.subr.bf16.mxu1 %v629_v1  ;;  %31 = vperm.xlu0 %576, %v27_v2   ;;  %v497_v5 = vpack.c.bf16 %v48_v4, %v47_v3  ;;  %v50_v7 = vld [vmem:[#allocation2 + $0x28] sm:$0xff]  ;;  %v51_v9 = vld [vmem:[#allocation2 + $0x30] sm:$0xff]  ;;  %v52_v10 = vld [vmem:[#allocation2 + $0x38] sm:$0xff]  ;;  %v684_v50 = vshrl.u32 %v39_v49, 7  ;;  %s330_s1 = sshll.u32 %s632_s0, 4  ;;  %s331_s1 = int_to_ptr.vmem [resolvable:$true] %s330_s1 }
  0x16   :  { %v500_v8 = vpack.c.bf16 %v50_v7, %v49_v6  ;;  %423 = vmatprep.mubr.msk.f32.mxu0 %vm630_vm0, %v631_v11  ;;  %458 = vmatprep.mubr.msk.f32.mxu1 %vm630_vm0, %v631_v11  ;;  %v503_v12 = vpack.c.bf16 %v52_v10, %v51_v9  ;;  %v53_v13 = vld [vmem:[#allocation2 + $0x40] sm:$0xff]  ;;  %v54_v14 = vld [vmem:[#allocation2 + $0x48] sm:$0xff]  ;;  %v140_v15 = vld [vmem:[#allocation2 + $0x90] sm:$0xff]  ;;  %s599_s25 = scalar_lea.vmem %s331_s1, 32  ;;  %p604_p9 = scmp.lt.s32.totalorder %s331_s1, %s331_s1 }
  0x17   :  { %498 = vmatpush3.bf16.msra.mxu0 %v497_v5  ;;  %v141_v16 = vld [vmem:[#allocation2 + $0x98] sm:$0xff]  ;;  %v142_v17 = vld [vmem:[#allocation2 + $0xa0] sm:$0xff]  ;;  %v143_v19 = vld [vmem:[#allocation2 + $0xa8] sm:$0xff]  ;;  %v506_v20 = vpack.c.bf16 %v54_v14, %v53_v13  ;;  %v41_v51 = vsub.s32 0, %v684_v50  ;;  %p600_p8 = scmp.ne.s32.totalorder %s331_s1, %s599_s25  ;;  %p605_p10 = scmp.lt.s32.totalorder %s599_s25, %s599_s25 }
  0x18   :  { %499 = vmatprep.subr.bf16.mxu0 %v629_v1  ;;  %v521_v18 = vpack.c.bf16 %v141_v16, %v140_v15  ;;  %v55_v21 = vld [vmem:[#allocation2 + $0x50] sm:$0xff]  ;;  %v524_v22 = vpack.c.bf16 %v143_v19, %v142_v17  ;;  %v56_v23 = vld [vmem:[#allocation2 + $0x58] sm:$0xff]  ;;  %v57_v27 = vld [vmem:[#allocation2 + $0x60] sm:$0xff] }
  0x19   :  { %v144_v24 = vld [vmem:[#allocation2 + $0xb0] sm:$0xff]  ;;  %v145_v25 = vld [vmem:[#allocation2 + $0xb8] sm:$0xff]  ;;  %v509_v26 = vpack.c.bf16 %v56_v23, %v55_v21  ;;  %v58_v29 = vld [vmem:[#allocation2 + $0x68] sm:$0xff]  ;;  %v65_v21 = vsub.s32 1, %v684_v50  ;;  %p606_p11 = por %p605_p10, %p604_p9 }
  0x1a   :  { %522 = vmatpush3.bf16.msra.mxu1 %v521_v18  ;;  %v527_v28 = vpack.c.bf16 %v145_v25, %v144_v24  ;;  %v146_v30 = vld [vmem:[#allocation2 + $0xc0] sm:$0xff]  ;;  %v147_v31 = vld [vmem:[#allocation2 + $0xc8] sm:$0xff]  ;;  %v512_v32 = vpack.c.bf16 %v58_v29, %v57_v27  ;;  %v59_v33 = vld [vmem:[#allocation2 + $0x70] sm:$0xff] }
  0x1b   :  { %501 = vmatpush3.bf16.msra.mxu0 %v500_v8  ;;  %523 = vmatprep.subr.bf16.mxu1 %v629_v1  ;;  %v530_v34 = vpack.c.bf16 %v147_v31, %v146_v30  ;;  %v60_v35 = vld [vmem:[#allocation2 + $0x78] sm:$0xff]  ;;  %v148_v36 = vld [vmem:[#allocation2 + $0xd0] sm:$0xff]  ;;  %v61_v39 = vld [vmem:[#allocation2 + $0x80] sm:$0xff]  ;;  %v158_v31 = vsub.s32 2, %v684_v50  ;;  %p607_p12 = pnand %p606_p11, %p600_p8 }
  0x1c   :  { %502 = vmatprep.subr.bf16.mxu0 %v629_v1  ;;  %v149_v37 = vld [vmem:[#allocation2 + $0xd8] sm:$0xff]  ;;  %v515_v38 = vpack.c.bf16 %v60_v35, %v59_v33  ;;  %v62_v41 = vld [vmem:[#allocation2 + $0x88] sm:$0xff]  ;;  %v150_v42 = vld [vmem:[#allocation2 + $0xe0] sm:$0xff] }
  0x1d   :  { %v533_v40 = vpack.c.bf16 %v149_v37, %v148_v36  ;;  %v151_v43 = vld [vmem:[#allocation2 + $0xe8] sm:$0xff]  ;;  %v518_v44 = vpack.c.bf16 %v62_v41, %v61_v39  ;;  %v152_v46 = vld [vmem:[#allocation2 + $0xf0] sm:$0xff]  ;;  %v153_v47 = vld [vmem:[#allocation2 + $0xf8] sm:$0xff]  ;;  %v251_v37 = vsub.s32 3, %v684_v50 }
  0x1e   :  { %525 = vmatpush3.bf16.msra.mxu1 %v524_v22  ;;  %v536_v45 = vpack.c.bf16 %v151_v43, %v150_v42  ;;  %v539_v48 = vpack.c.bf16 %v153_v47, %v152_v46  ;;  %v687_v52 = vld [vmem:[#allocation2] sm:$0xff]  ;;  %v339_v53 = vld [vmem:[#allocation2 + $0x8] ss:$0 sm:$0xff]  ;;  %v233_v63 = vld [vmem:[#allocation2 + $0x110] sm:$0xff] }
  0x1f   :  { %504 = vmatpush3.bf16.msra.mxu0 %v503_v12  ;;  %526 = vmatprep.subr.bf16.mxu1 %v629_v1  ;;  %v42_v54 = vrot.slane %v687_v52, %v41_v51  ;;  %v154_v60 = vld [vmem:[#allocation2 + $0x100] sm:$0xff]  ;;  %v155_v61 = vld [vmem:[#allocation2 + $0x108] sm:$0xff]  ;;  %v234_v0 = vld [vmem:[#allocation2 + $0x118] sm:$0xff]  ;;  %v66_v22 = vrot.slane %v687_v52, %v65_v21 }
  0x20   :  { %505 = vmatprep.subr.bf16.mxu0 %v629_v1  ;;  %v542_v62 = vpack.c.bf16 %v155_v61, %v154_v60  ;;  %v235_v2 = vld [vmem:[#allocation2 + $0x120] sm:$0xff]  ;;  %v545_v3 = vpack.c.bf16 %v234_v0, %v233_v63  ;;  %v236_v4 = vld [vmem:[#allocation2 + $0x128] sm:$0xff]  ;;  %v237_v6 = vld [vmem:[#allocation2 + $0x130] sm:$0xff] }
  0x21   :  { %v548_v5 = vpack.c.bf16 %v236_v4, %v235_v2  ;;  %v238_v7 = vld [vmem:[#allocation2 + $0x138] sm:$0xff]  ;;  %v239_v9 = vld [vmem:[#allocation2 + $0x140] sm:$0xff]  ;;  %v240_v10 = vld [vmem:[#allocation2 + $0x148] sm:$0xff] }
  0x22   :  { %528 = vmatpush3.bf16.msra.mxu1 %v527_v28  ;;  %v551_v8 = vpack.c.bf16 %v238_v7, %v237_v6  ;;  %v241_v12 = vld [vmem:[#allocation2 + $0x150] sm:$0xff]  ;;  %v242_v13 = vld [vmem:[#allocation2 + $0x158] sm:$0xff]  ;;  %v243_v15 = vld [vmem:[#allocation2 + $0x160] sm:$0xff] }
  0x23   :  { %507 = vmatpush3.bf16.msra.mxu0 %v506_v20  ;;  %529 = vmatprep.subr.bf16.mxu1 %v629_v1  ;;  %v557_v14 = vpack.c.bf16 %v242_v13, %v241_v12  ;;  %v244_v16 = vld [vmem:[#allocation2 + $0x168] sm:$0xff]  ;;  %v245_v18 = vld [vmem:[#allocation2 + $0x170] sm:$0xff]  ;;  %v246_v19 = vld [vmem:[#allocation2 + $0x178] sm:$0xff] }
  0x24   :  { %508 = vmatprep.subr.bf16.mxu0 %v629_v1  ;;  %v560_v17 = vpack.c.bf16 %v244_v16, %v243_v15  ;;  %v563_v20 = vpack.c.bf16 %v246_v19, %v245_v18  ;;  %v247_v28 = vld [vmem:[#allocation2 + $0x180] sm:$0xff]  ;;  %v248_v29 = vld [vmem:[#allocation2 + $0x188] sm:$0xff] }
  0x25   :  { %v566_v30 = vpack.c.bf16 %v248_v29, %v247_v28 }
  0x26   :  { %531 = vmatpush3.bf16.msra.mxu1 %v530_v34 }
  0x27   :  { %510 = vmatpush3.bf16.msra.mxu0 %v509_v26  ;;  %532 = vmatprep.subr.bf16.mxu1 %v629_v1 }
  0x28   :  { %511 = vmatprep.subr.bf16.mxu0 %v629_v1 }
  0x2a   :  { %534 = vmatpush3.bf16.msra.mxu1 %v533_v40 }
  0x2b   :  { %513 = vmatpush3.bf16.msra.mxu0 %v512_v32  ;;  %535 = vmatprep.subr.bf16.mxu1 %v629_v1  ;;  %v159_v32 = vrot.slane %v687_v52, %v158_v31 }
  0x2c   :  { %514 = vmatprep.subr.bf16.mxu0 %v629_v1 }
  0x2e   :  { %537 = vmatpush3.bf16.msra.mxu1 %v536_v45 }
  0x2f   :  { %516 = vmatpush3.bf16.msra.mxu0 %v515_v38  ;;  %538 = vmatprep.subr.bf16.mxu1 %v629_v1  ;;  %v252_v38 = vrot.slane %v687_v52, %v251_v37 }
  0x30   :  { %517 = vmatprep.subr.bf16.mxu0 %v629_v1 }
  0x32   :  { %540 = vmatpush3.bf16.msra.mxu1 %v539_v48 }
  0x33   :  { %519 = vmatpush3.bf16.msra.mxu0 %v518_v44  ;;  %541 = vmatprep.subr.bf16.mxu1 %v629_v1 }
  0x34   :  { %544 = vmatprep.subr.bf16.mxu0 %v629_v1 }
  0x36   :  { %543 = vmatpush3.bf16.msra.mxu1 %v542_v62 }
  0x94   :  { %v32_v55 = vpop.permute.xlu0 %31 }
  0x95   :  { %v38_v56 = vmul.f32 %v339_v53, %v32_v55 }
  0x97   :  { %v43_v57 = vadd.f32 %v42_v54, %v38_v56 }
  0x99   :  { %vm44_vm1 = vcmp.gt.f32.partialorder %v43_v57, 0.0  ;;  %v45_v58 = vmul.f32 0.1, %v43_v57 }
  0x9b   :  { %v46_v59 = vsel %vm44_vm1, %v43_v57, %v45_v58 }
  0x9c   :  { %424 = vmatmul.mubr.f32.vlgmr.msra.gmra.mrb[0].mxu0 %v46_v59 }
  0x9d   :  { %493 = vmatprep.mubr.msk.f32.mxu0 %vm630_vm0, %v631_v11  ;;  %546 = vmatpush3.bf16.msra.mxu0 %v545_v3  ;;  %v554_v11 = vpack.c.bf16 %v240_v10, %v239_v9 }
  0x9e   :  { %547 = vmatprep.subr.bf16.mxu0 %v629_v1 }
  0xa1   :  { %549 = vmatpush3.bf16.msra.mxu0 %v548_v5 }
  0xa2   :  { %550 = vmatprep.subr.bf16.mxu0 %v629_v1 }
  0xa5   :  { %552 = vmatpush3.bf16.msra.mxu0 %v551_v8 }
  0xa6   :  { %553 = vmatprep.subr.bf16.mxu0 %v629_v1 }
  0xa9   :  { %555 = vmatpush3.bf16.msra.mxu0 %v554_v11 }
  0xaa   :  { %556 = vmatprep.subr.bf16.mxu0 %v629_v1 }
  0xad   :  { %558 = vmatpush3.bf16.msra.mxu0 %v557_v14 }
  0xae   :  { %559 = vmatprep.subr.bf16.mxu0 %v629_v1 }
  0xb1   :  { %561 = vmatpush3.bf16.msra.mxu0 %v560_v17 }
  0xb2   :  { %562 = vmatprep.subr.bf16.mxu0 %v629_v1 }
  0xb5   :  { %564 = vmatpush3.bf16.msra.mxu0 %v563_v20 }
  0xb6   :  { %565 = vmatprep.subr.bf16.mxu0 %v629_v1 }
  0xb9   :  { %567 = vmatpush3.bf16.msra.mxu0 %v566_v30 }
 0x16f   :  { %v133_v23 = vpop.f32.mrb[0].mxu0 }
 0x170   :  { %v134_v24 = vadd.f32 %v133_v23, %v66_v22  ;;  %v425_v25 = vpop.f32.mrb[1].mxu0 }
 0x172   :  { %v138_v26 = vmul.f32 0.1, %v134_v24  ;;  %vm137_vm2 = vcmp.gt.f32.partialorder %v134_v24, 0.0 }
 0x174   :  { %v139_v27 = vsel %vm137_vm2, %v134_v24, %v138_v26 }
 0x175   :  { %459 = vmatmul.mubr.f32.vlgmr.msra.gmra.mrb[0].mxu1 %v139_v27 }
 0x248   :  { %v226_v1 = vpop.f32.mrb[0].mxu1 }
 0x249   :  { %v227_v33 = vadd.f32 %v226_v1, %v159_v32  ;;  %v460_v34 = vpop.f32.mrb[1].mxu1 }
 0x24b   :  { %vm230_vm3 = vcmp.gt.f32.partialorder %v227_v33, 0.0  ;;  %v231_v35 = vmul.f32 0.1, %v227_v33 }
 0x24d   :  { %v232_v36 = vsel %vm230_vm3, %v227_v33, %v231_v35 }
 0x24e   :  { %494 = vmatmul.mubr.f32.vlgmr.msra.gmra.mrb[2].mxu0 %v232_v36 }
 0x321   :  { %v319_v39 = vpop.f32.mrb[2].mxu0 }
 0x322   :  { %v320_v40 = vadd.f32 %v319_v39, %v252_v38  ;;  %v495_v41 = vpop.f32.mrb[3].mxu0 }
 0x324   :  { %323 = vst [vmem:[#allocation5] sm:$0x3] %v320_v40 }
 0x325   :  { %610 = shalt.err (!%p607_p12)
}
 0x326   :  { %s611_s28 = scalar_lea.hbm %s719_s2, 32 }
 0x327   :  { %p612_p13 = scmp.ne.s32.totalorder %s719_s2, %s611_s28  ;;  %p615_p0 = scmp.lt.u32.totalorder %s611_s28, %s719_s2 }
 0x329   :  { %p617_p1 = pnand %p615_p0, %p612_p13 }
 0x32b   :  { %620 = shalt.err (!%p617_p1)
}
 0x32c   :  { %333 = dma.vmem_to_hbm [thread:$0]  %s331_s1, 32, %s719_s2, [#allocation4]  }
 0x32d   :  { %623 = dma.done.wait [#allocation4], 32  }
 0x32e   :  { %624 = vsyncadd [#allocation4], 4294967264 }
 0x32f   :  { %337 = vsyncpa [#allocation3], 1 }
 0x330   :  { %338 = vsyncpa [#allocation4], 1 }

</bundles_post_ra>
